<compile_context>
chip_gen: v6e
topology: v6e:2x2x1
jax: 0.10.0
libtpu: 0.0.40
codegen_flags: <defaults>
</compile_context>

<pallas_src>
import functools

import numpy as np
import jax
import jax.numpy as jnp
from jax.experimental import pallas as pl
from jax.experimental.pallas import tpu as pltpu


DH_PAD = 128   # per-head q/k/v width padded to one full lane group


# ----------------------------------------------------------------------------
# helpers
# ----------------------------------------------------------------------------
def _tile(dim, pref, base):
    """Largest tile <= pref that divides dim and is a multiple of base, else dim."""
    if dim <= pref:
        return dim
    t = (pref // base) * base
    while t >= base:
        if dim % t == 0:
            return t
        t -= base
    return dim


def _tile_m(M, pref=256):
    """M tile; keep >=2 blocks on the parallel M axis when possible (v7x megacore)."""
    pref = min(pref, max(8, (M // 16) * 8))
    return _tile(M, pref, 8)


def _vmem_limit(block_bytes):
    """Explicit VMEM budget: measured block footprint + headroom, capped below
    the physical per-core VMEM (leaves room for Mosaic internal scratch)."""
    try:
        cap = int(pltpu.get_tpu_info().vmem_capacity_bytes)
    except Exception:
        cap = 64 << 20
    cap = (cap * 7) // 10
    need = int(block_bytes) + (2 << 20)
    return int(max(16 << 20, min(need, cap)))


def _pad_rows_to_128(w_t):
    """Zero-pad the contraction (row) dim of a [K, N] operand to a 128 multiple."""
    K = w_t.shape[0]
    Kp = ((K + 127) // 128) * 128
    if Kp != K:
        w_t = jnp.pad(w_t, ((0, Kp - K), (0, 0)))
    return w_t


# ----------------------------------------------------------------------------
# Pallas kernels
# ----------------------------------------------------------------------------
def _linear_kernel(x_ref, w_ref, b_ref, o_ref, acc_ref, *, relu, n_k):
    k = pl.program_id(2)

    @pl.when(k == 0)
    def _():
        acc_ref[...] = jnp.zeros_like(acc_ref)

    acc_ref[...] += jnp.dot(x_ref[...].astype(jnp.bfloat16), w_ref[...],
                            preferred_element_type=jnp.float32)

    @pl.when(k == n_k - 1)
    def _():
        y = acc_ref[...] + b_ref[...]
        if relu:
            y = jnp.maximum(y, 0.0)
        o_ref[...] = y.astype(o_ref.dtype)


def linear(x, w_t, b, relu=False, out_dtype=jnp.float32):
    """y = x @ w_t + b (optionally relu). x:[M,K0], w_t:[K,N] bf16 (K>=K0 padded)."""
    M = x.shape[0]
    K, N = w_t.shape
    if x.shape[1] != K:                      # weights were zero-padded along K
        x = jnp.pad(x, ((0, 0), (0, K - x.shape[1])))
    tm = _tile_m(M)
    tn = _tile(N, 512, 128)
    tk = _tile(K, 512, 128)
    n_k = K // tk
    kern = functools.partial(_linear_kernel, relu=relu, n_k=n_k)
    xb = x.dtype.itemsize
    ob = np.dtype(out_dtype).itemsize
    blk_bytes = 2 * (tm * tk * xb + tk * tn * 2 + tn * 4 + tm * tn * ob) + tm * tn * 4
    cost = pl.CostEstimate(flops=2 * M * N * K, transcendentals=0,
                           bytes_accessed=M * K * xb + K * N * 2 + M * N * ob)
    return pl.pallas_call(
        kern,
        out_shape=jax.ShapeDtypeStruct((M, N), out_dtype),
        grid=(M // tm, N // tn, n_k),
        in_specs=[
            pl.BlockSpec((tm, tk), lambda i, j, k: (i, k)),
            pl.BlockSpec((tk, tn), lambda i, j, k: (k, j)),
            pl.BlockSpec((1, tn), lambda i, j, k: (0, j)),
        ],
        out_specs=pl.BlockSpec((tm, tn), lambda i, j, k: (i, j)),
        scratch_shapes=[pltpu.VMEM((tm, tn), jnp.float32)],
        compiler_params=pltpu.CompilerParams(
            dimension_semantics=("parallel", "parallel", "arbitrary"),
            vmem_limit_bytes=_vmem_limit(blk_bytes)),
        cost_estimate=cost,
    )(x, w_t, b.reshape(1, N))


def _linear_add_ln_kernel(x_ref, w_ref, b_ref, r_ref, g_ref, bt_ref,
                          o_ref, acc_ref, *, eps, n_k):
    k = pl.program_id(1)

    @pl.when(k == 0)
    def _():
        acc_ref[...] = jnp.zeros_like(acc_ref)

    acc_ref[...] += jnp.dot(x_ref[...].astype(jnp.bfloat16), w_ref[...],
                            preferred_element_type=jnp.float32)

    @pl.when(k == n_k - 1)
    def _():
        y = acc_ref[...] + b_ref[...] + r_ref[...]       # bias + residual (f32)
        mu = jnp.mean(y, axis=-1, keepdims=True)
        var = jnp.mean((y - mu) ** 2, axis=-1, keepdims=True)
        o_ref[...] = ((y - mu) * jax.lax.rsqrt(var + eps)
                      * g_ref[...] + bt_ref[...]).astype(o_ref.dtype)


def linear_add_layernorm(x, w_t, b, resid, gamma, beta, eps=1e-5):
    """LayerNorm(resid + x @ w_t + b) fused in one pass. x:[M,K], w_t:[K,D] bf16."""
    M, K = x.shape
    D = w_t.shape[1]
    tm = _tile_m(M)
    tk = _tile(K, 512, 128)
    n_k = K // tk
    kern = functools.partial(_linear_add_ln_kernel, eps=eps, n_k=n_k)
    xb = x.dtype.itemsize
    blk_bytes = (2 * (tm * tk * xb + tk * D * 2 + 3 * D * 4 + 2 * tm * D * 4)
                 + tm * D * 4)
    cost = pl.CostEstimate(flops=2 * M * K * D, transcendentals=0,
                           bytes_accessed=M * K * xb + K * D * 2 + 3 * M * D * 4)
    return pl.pallas_call(
        kern,
        out_shape=jax.ShapeDtypeStruct((M, D), jnp.float32),
        grid=(M // tm, n_k),
        in_specs=[
            pl.BlockSpec((tm, tk), lambda i, k: (i, k)),
            pl.BlockSpec((tk, D), lambda i, k: (k, 0)),
            pl.BlockSpec((1, D), lambda i, k: (0, 0)),
            pl.BlockSpec((tm, D), lambda i, k: (i, 0)),
            pl.BlockSpec((1, D), lambda i, k: (0, 0)),
            pl.BlockSpec((1, D), lambda i, k: (0, 0)),
        ],
        out_specs=pl.BlockSpec((tm, D), lambda i, k: (i, 0)),
        scratch_shapes=[pltpu.VMEM((tm, D), jnp.float32)],
        compiler_params=pltpu.CompilerParams(
            dimension_semantics=("parallel", "arbitrary"),
            vmem_limit_bytes=_vmem_limit(blk_bytes)),
        cost_estimate=cost,
    )(x, w_t, b.reshape(1, D), resid, gamma.reshape(1, D), beta.reshape(1, D))


def _ffn_kernel(x_ref, w1_ref, b1_ref, w2_ref, b2_ref, g_ref, bt_ref,
                o_ref, acc_ref, *, eps, n_f):
    f = pl.program_id(1)

    @pl.when(f == 0)
    def _():
        acc_ref[...] = jnp.zeros_like(acc_ref)

    h = jnp.dot(x_ref[...].astype(jnp.bfloat16), w1_ref[...],
                preferred_element_type=jnp.float32) + b1_ref[...]
    h = jnp.maximum(h, 0.0)
    acc_ref[...] += jnp.dot(h.astype(jnp.bfloat16), w2_ref[...],
                            preferred_element_type=jnp.float32)

    @pl.when(f == n_f - 1)
    def _():
        # x is also the residual for the FFN sub-layer (kept f32).
        y = acc_ref[...] + b2_ref[...] + x_ref[...]
        mu = jnp.mean(y, axis=-1, keepdims=True)
        var = jnp.mean((y - mu) ** 2, axis=-1, keepdims=True)
        o_ref[...] = ((y - mu) * jax.lax.rsqrt(var + eps)
                      * g_ref[...] + bt_ref[...]).astype(o_ref.dtype)


def ffn_add_layernorm(x, w1_t, b1, w2_t, b2, gamma, beta, eps=1e-5):
    """LayerNorm(x + relu(x@w1_t+b1)@w2_t+b2); the (M,dff) hidden stays in VMEM."""
    M, D = x.shape
    dff = w1_t.shape[1]
    tm = _tile_m(M)
    tf = _tile(dff, 512, 128)
    n_f = dff // tf
    kern = functools.partial(_ffn_kernel, eps=eps, n_f=n_f)
    blk_bytes = (2 * (tm * D * 4 + D * tf * 2 + tf * 4 + tf * D * 2 + 3 * D * 4
                      + tm * D * 4) + tm * D * 4)
    cost = pl.CostEstimate(flops=4 * M * D * dff, transcendentals=0,
                           bytes_accessed=2 * M * D * 4 + 2 * D * dff * 2)
    return pl.pallas_call(
        kern,
        out_shape=jax.ShapeDtypeStruct((M, D), jnp.float32),
        grid=(M // tm, n_f),
        in_specs=[
            pl.BlockSpec((tm, D), lambda i, f: (i, 0)),
            pl.BlockSpec((D, tf), lambda i, f: (0, f)),
            pl.BlockSpec((1, tf), lambda i, f: (0, f)),
            pl.BlockSpec((tf, D), lambda i, f: (f, 0)),
            pl.BlockSpec((1, D), lambda i, f: (0, 0)),
            pl.BlockSpec((1, D), lambda i, f: (0, 0)),
            pl.BlockSpec((1, D), lambda i, f: (0, 0)),
        ],
        out_specs=pl.BlockSpec((tm, D), lambda i, f: (i, 0)),
        scratch_shapes=[pltpu.VMEM((tm, D), jnp.float32)],
        compiler_params=pltpu.CompilerParams(
            dimension_semantics=("parallel", "arbitrary"),
            vmem_limit_bytes=_vmem_limit(blk_bytes)),
        cost_estimate=cost,
    )(x, w1_t, b1.reshape(1, dff), w2_t, b2.reshape(1, D),
      gamma.reshape(1, D), beta.reshape(1, D))


def _mha_kernel(qkv_ref, bias_ref, o_ref, *, dh_pad, scale):
    # qkv block: (1, S, 3*dh_pad) bf16 = this (batch, head)'s [q | k | v] bands.
    blk = qkv_ref[0]                              # (S, 3*dh_pad)
    q = blk[:, :dh_pad]                           # 128-lane-aligned static slices
    k = blk[:, dh_pad:2 * dh_pad]
    v = blk[:, 2 * dh_pad:3 * dh_pad]
    # contract last dims directly (no k.T materialization); padded dims are 0
    s = jax.lax.dot_general(q, k, (((1,), (1,)), ((), ())),
                            preferred_element_type=jnp.float32)
    s = s * scale + bias_ref[0]                   # additive key-padding bias (1,S)
    m = jnp.max(s, axis=-1, keepdims=True)
    p = jnp.exp(s - m)
    denom = jnp.sum(p, axis=-1, keepdims=True)
    o = jnp.dot(p.astype(v.dtype), v, preferred_element_type=jnp.float32)
    o_ref[0] = (o * pl.reciprocal(denom, approx=True)).astype(o_ref.dtype)


def multi_head_attention(qkv, mask_bias, nhead, dh):
    """qkv: [B, S, nhead*3*DH_PAD] head-major/padded bf16; mask_bias: [B,1,S] f32."""
    B, S, _ = qkv.shape
    kern = functools.partial(_mha_kernel, dh_pad=DH_PAD,
                             scale=float(dh) ** -0.5)     # Python float, not traced
    blk_bytes = 2 * (S * 3 * DH_PAD * 2 + S * 4 + S * DH_PAD * 2) + S * S * 4
    return pl.pallas_call(
        kern,
        out_shape=jax.ShapeDtypeStruct((B, S, nhead * DH_PAD), jnp.bfloat16),
        grid=(B, nhead),
        in_specs=[
            pl.BlockSpec((1, S, 3 * DH_PAD), lambda b, h: (b, 0, h)),
            pl.BlockSpec((1, 1, S), lambda b, h: (b, 0, 0)),
        ],
        out_specs=pl.BlockSpec((1, S, DH_PAD), lambda b, h: (b, 0, h)),
        compiler_params=pltpu.CompilerParams(
            dimension_semantics=("parallel", "parallel"),
            vmem_limit_bytes=_vmem_limit(blk_bytes)),
    )(qkv, mask_bias)


# ----------------------------------------------------------------------------
# Model wrapper (glue in plain JAX; hot paths in Pallas)
# ----------------------------------------------------------------------------
def encoder_layer_fwd(x, mask_bias, p, nhead):
    """One post-norm nn.TransformerEncoderLayer (relu activation, eval mode)."""
    B, S, D = x.shape
    M = B * S
    x2 = x.reshape(M, D)

    # fused QKV projection -> head-major, 128-padded per-head bands (bf16)
    qkv = linear(x2, p["w_in_t"], p["b_in_p"], out_dtype=jnp.bfloat16)
    attn = multi_head_attention(qkv.reshape(B, S, nhead * 3 * DH_PAD),
                                mask_bias, nhead, dh=D // nhead)
    # out-projection + residual + LayerNorm fused
    x2 = linear_add_layernorm(attn.reshape(M, nhead * DH_PAD), p["w_out_t"],
                              p["b_out"], x2, p["ln1_g"], p["ln1_b"])
    # feed-forward (FF1 + relu + FF2 + residual + LN fused; hidden stays in VMEM)
    x2 = ffn_add_layernorm(x2, p["w_ff1_t"], p["b_ff1"], p["w_ff2_t"],
                           p["b_ff2"], p["ln2_g"], p["ln2_b"])
    return x2.reshape(B, S, D)


def decoder_transformer_fwd(x, input_masks_invert, params, nhead):
    """x: [B, S, D] float32; input_masks_invert: [B, S] (1 = masked)."""
    B, S, D = x.shape
    mask_bias = (input_masks_invert.astype(jnp.float32)
                 * jnp.float32(-1e9)).reshape(B, 1, S)
    for p in params["layers"]:
        x = encoder_layer_fwd(x, mask_bias, p, nhead)
    out = linear(x.reshape(B * S, D), params["fc1_w_t"], params["fc1_b"],
                 relu=True)
    # TODO(synk): the trailing external `self.pretrained(...)` seq2seq LM (BART)
    # call with labels has no Pallas equivalent; return the encoded embeddings.
    return out.reshape(B, S, -1)


# ----------------------------------------------------------------------------
# Parameter init: PyTorch-layout f32 originals + packed/padded bf16 kernel copies
# ----------------------------------------------------------------------------
def _pack_qkv(w_in, b_in, d_model, nhead):
    """Repack PyTorch in_proj (3D, D) into head-major (D, nhead*3*DH_PAD) with
    each head's q/k/v zero-padded to a 128-lane band."""
    dh = d_model // nhead
    wt = w_in.T                                           # (D, 3D)
    wt_p = jnp.zeros((d_model, nhead * 3 * DH_PAD), jnp.float32)
    b_p = jnp.zeros((nhead * 3 * DH_PAD,), jnp.float32)
    for h in range(nhead):
        for c in range(3):                                # q, k, v
            src = c * d_model + h * dh
            dst = h * 3 * DH_PAD + c * DH_PAD
            wt_p = wt_p.at[:, dst:dst + dh].set(wt[:, src:src + dh])
            b_p = b_p.at[dst:dst + dh].set(b_in[src:src + dh])
    return wt_p, b_p


def _pack_out_proj(w_out, d_model, nhead):
    """Pad out_proj^T input rows to match the head-major, DH_PAD-padded layout."""
    dh = d_model // nhead
    wt = w_out.T                                          # (D, D)
    wt_p = jnp.zeros((nhead * DH_PAD, d_model), jnp.float32)
    for h in range(nhead):
        wt_p = wt_p.at[h * DH_PAD:h * DH_PAD + dh, :].set(wt[h * dh:(h + 1) * dh, :])
    return wt_p


def init_params(key, d_model, nhead, dff, dec_emb, num_layers):
    layers = []
    for _ in range(num_layers):
        keys = jax.random.split(key, 9)
        key = keys[0]
        w_in = jax.random.normal(keys[1], (3 * d_model, d_model), jnp.float32) * 0.02
        b_in = jax.random.normal(keys[2], (3 * d_model,), jnp.float32) * 0.02
        w_out = jax.random.normal(keys[3], (d_model, d_model), jnp.float32) * 0.02
        b_out = jax.random.normal(keys[4], (d_model,), jnp.float32) * 0.02
        w_ff1 = jax.random.normal(keys[5], (dff, d_model), jnp.float32) * 0.02
        b_ff1 = jax.random.normal(keys[6], (dff,), jnp.float32) * 0.02
        w_ff2 = jax.random.normal(keys[7], (d_model, dff), jnp.float32) * 0.02
        b_ff2 = jax.random.normal(keys[8], (d_model,), jnp.float32) * 0.02

        qkv_wt, qkv_b = _pack_qkv(w_in, b_in, d_model, nhead)
        out_wt = _pack_out_proj(w_out, d_model, nhead)

        layers.append(dict(
            # f32 PyTorch-layout copies (used only by the pure-JAX reference)
            w_in=w_in, b_in=b_in, w_out=w_out, b_out=b_out,
            w_ff1=w_ff1, b_ff1=b_ff1, w_ff2=w_ff2, b_ff2=b_ff2,
            ln1_g=jnp.ones((d_model,), jnp.float32),
            ln1_b=jnp.zeros((d_model,), jnp.float32),
            ln2_g=jnp.ones((d_model,), jnp.float32),
            ln2_b=jnp.zeros((d_model,), jnp.float32),
            # bf16 kernel operands, pre-transposed / packed / padded ONCE here
            w_in_t=_pad_rows_to_128(qkv_wt).astype(jnp.bfloat16),
            b_in_p=qkv_b,
            w_out_t=out_wt.astype(jnp.bfloat16),
            w_ff1_t=w_ff1.T.astype(jnp.bfloat16),
            w_ff2_t=w_ff2.T.astype(jnp.bfloat16),
        ))
    kf = jax.random.split(key, 3)
    fc1_w = jax.random.normal(kf[1], (dec_emb, d_model), jnp.float32) * 0.02
    fc1_b = jax.random.normal(kf[2], (dec_emb,), jnp.float32) * 0.02
    return dict(layers=layers, fc1_w=fc1_w, fc1_b=fc1_b,
                fc1_w_t=_pad_rows_to_128(fc1_w.T).astype(jnp.bfloat16))


# ----------------------------------------------------------------------------
# Pure-JAX f32 reference (PyTorch semantics) for correctness check
# ----------------------------------------------------------------------------
def reference_fwd(x, invert_mask, params, nhead):
    B, S, D = x.shape
    Dh = D // nhead
    bias = (invert_mask.astype(jnp.float32) * -1e9).reshape(B, 1, 1, S)

    def ln(y, g, b):
        mu = jnp.mean(y, -1, keepdims=True)
        var = jnp.mean((y - mu) ** 2, -1, keepdims=True)
        return (y - mu) * jax.lax.rsqrt(var + 1e-5) * g + b

    for p in params["layers"]:
        qkv = x @ p["w_in"].T + p["b_in"]
        q, k, v = jnp.split(qkv, 3, axis=-1)
        q = q.reshape(B, S, nhead, Dh).transpose(0, 2, 1, 3)
        k = k.reshape(B, S, nhead, Dh).transpose(0, 2, 1, 3)
        v = v.reshape(B, S, nhead, Dh).transpose(0, 2, 1, 3)
        s = jnp.einsum("bhqd,bhkd->bhqk", q, k) / jnp.sqrt(jnp.float32(Dh)) + bias
        a = jax.nn.softmax(s, axis=-1)
        o = jnp.einsum("bhqk,bhkd->bhqd", a, v).transpose(0, 2, 1, 3).reshape(B, S, D)
        o = o @ p["w_out"].T + p["b_out"]
        x = ln(x + o, p["ln1_g"], p["ln1_b"])
        h = jnp.maximum(x @ p["w_ff1"].T + p["b_ff1"], 0.0) @ p["w_ff2"].T + p["b_ff2"]
        x = ln(x + h, p["ln2_g"], p["ln2_b"])
    return jnp.maximum(x @ params["fc1_w"].T + params["fc1_b"], 0.0)


# ----------------------------------------------------------------------------
if __name__ == "__main__":
    # Small shapes consistent with the module (d_model divisible by nhead=8).
    B, S = 2, 8
    in_feature = 128          # stands in for 840
    nhead = 8
    dff = 256                 # stands in for 2048
    dec_emb = 256             # stands in for 1024
    num_layers = 2            # stands in for 8

    root = jax.random.PRNGKey(0)
    k_x, k_p = jax.random.split(root)
    x = jax.random.normal(k_x, (B, S, in_feature), jnp.float32)

    # input_masks_invert: 1 = masked. Mask the last 2 positions of batch 1.
    invert_mask = jnp.zeros((B, S), jnp.int32).at[1, S - 2:].set(1)

    params = init_params(k_p, in_feature, nhead, dff, dec_emb, num_layers)

    out = decoder_transformer_fwd(x, invert_mask, params, nhead)
    out = jax.block_until_ready(out)

    ref = reference_fwd(x, invert_mask, params, nhead)
    assert out.shape == (B, S, dec_emb)
    # bf16 matmul operands vs f32 reference -> loosened tolerance
    assert jnp.allclose(out, ref, rtol=3e-2, atol=3e-2)

    print("KERNEL_OK")
</pallas_src>

<mosaic_0001>
module attributes {stable_mosaic.version = 11 : i64} {
  func.func @_linear_kernel(%arg0: i32, %arg1: i32, %arg2: i32, %arg3: memref<8x128xf32, #tpu.memory_space<vmem>>, %arg4: memref<128x512xbf16, #tpu.memory_space<vmem>>, %arg5: memref<1x512xf32, #tpu.memory_space<vmem>>, %arg6: memref<8x512xbf16, #tpu.memory_space<vmem>>, %arg7: memref<8x512xf32, #tpu.memory_space<vmem>>) attributes {dimension_semantics = [#tpu.dimension_semantics<parallel>, #tpu.dimension_semantics<parallel>, #tpu.dimension_semantics<arbitrary>], iteration_bounds = array<i64: 2, 6, 1>, scalar_prefetch = 0 : i64, scratch_operands = 1 : i64, tpu.core_type = #tpu.core_type<tc>, window_params = [{transform_indices = @transform_0, window_bounds = array<i64: 8, 128>}, {transform_indices = @transform_1, window_bounds = array<i64: 128, 512>}, {transform_indices = @transform_2, window_bounds = array<i64: 1, 512>}, {transform_indices = @transform_3, window_bounds = array<i64: 8, 512>}]} {
    %c0_i32 = arith.constant 0 : i32
    %0 = arith.cmpi eq, %arg2, %c0_i32 : i32
    %1 = arith.extui %0 : i1 to i32
    %c0_i32_0 = arith.constant 0 : i32
    %2 = arith.cmpi ne, %1, %c0_i32_0 : i32
    scf.if %2 {
      %cst_10 = arith.constant 0.000000e+00 : f32
      %13 = vector.broadcast %cst_10 : f32 to vector<8x512xf32>
      %c0_11 = arith.constant 0 : index
      %c0_12 = arith.constant 0 : index
      %14 = vector.load %arg7[%c0_11, %c0_12] : memref<8x512xf32, #tpu.memory_space<vmem>>, vector<8x512xf32>
      tpu.vector_store %arg7[%c0_11, %c0_12], %13 {strides = array<i32>} : memref<8x512xf32, #tpu.memory_space<vmem>>, vector<8x512xf32>,
    } else {
    }
    %c0 = arith.constant 0 : index
    %c0_1 = arith.constant 0 : index
    %3 = vector.load %arg7[%c0, %c0_1] : memref<8x512xf32, #tpu.memory_space<vmem>>, vector<8x512xf32>
    %c0_2 = arith.constant 0 : index
    %c0_3 = arith.constant 0 : index
    %4 = vector.load %arg3[%c0_2, %c0_3] : memref<8x128xf32, #tpu.memory_space<vmem>>, vector<8x128xf32>
    %5 = arith.truncf %4 : vector<8x128xf32> to vector<8x128xbf16>
    %c0_4 = arith.constant 0 : index
    %c0_5 = arith.constant 0 : index
    %6 = vector.load %arg4[%c0_4, %c0_5] : memref<128x512xbf16, #tpu.memory_space<vmem>>, vector<128x512xbf16>
    %cst = arith.constant dense<0.000000e+00> : vector<8x512xf32>
    %7 = tpu.matmul %5, %6, %cst {dimension_numbers = #tpu.dot_dimension_numbers<[1], [0], [0], [1], [0, 0, 1, 1], [], []>} : vector<8x128xbf16>, vector<128x512xbf16>, vector<8x512xf32> -> vector<8x512xf32>
    %8 = arith.addf %3, %7 : vector<8x512xf32>
    %c0_6 = arith.constant 0 : index
    %c0_7 = arith.constant 0 : index
    %9 = vector.load %arg7[%c0_6, %c0_7] : memref<8x512xf32, #tpu.memory_space<vmem>>, vector<8x512xf32>
    tpu.vector_store %arg7[%c0_6, %c0_7], %8 {strides = array<i32>} : memref<8x512xf32, #tpu.memory_space<vmem>>, vector<8x512xf32>,
    %c0_i32_8 = arith.constant 0 : i32
    %10 = arith.cmpi eq, %arg2, %c0_i32_8 : i32
    %11 = arith.extui %10 : i1 to i32
    %c0_i32_9 = arith.constant 0 : i32
    %12 = arith.cmpi ne, %11, %c0_i32_9 : i32
    scf.if %12 {
      %c0_10 = arith.constant 0 : index
      %c0_11 = arith.constant 0 : index
      %13 = vector.load %arg7[%c0_10, %c0_11] : memref<8x512xf32, #tpu.memory_space<vmem>>, vector<8x512xf32>
      %c0_12 = arith.constant 0 : index
      %c0_13 = arith.constant 0 : index
      %14 = vector.load %arg5[%c0_12, %c0_13] : memref<1x512xf32, #tpu.memory_space<vmem>>, vector<1x512xf32>
      %15 = vector.broadcast %14 : vector<1x512xf32> to vector<8x512xf32>
      %16 = arith.addf %13, %15 : vector<8x512xf32>
      %17 = arith.truncf %16 : vector<8x512xf32> to vector<8x512xbf16>
      %c0_14 = arith.constant 0 : index
      %c0_15 = arith.constant 0 : index
      %18 = vector.load %arg6[%c0_14, %c0_15] : memref<8x512xbf16, #tpu.memory_space<vmem>>, vector<8x512xbf16>
      tpu.vector_store %arg6[%c0_14, %c0_15], %17 {strides = array<i32>} : memref<8x512xbf16, #tpu.memory_space<vmem>>, vector<8x512xbf16>,
    } else {
    }
    return
  }
  func.func @transform_0(%arg0: i32, %arg1: i32, %arg2: i32) -> (i32, i32) {
    %c0_i32 = arith.constant 0 : i32
    return %arg0, %arg2 : i32, i32
  }
  func.func @transform_1(%arg0: i32, %arg1: i32, %arg2: i32) -> (i32, i32) {
    %c0_i32 = arith.constant 0 : i32
    return %arg2, %arg1 : i32, i32
  }
  func.func @transform_2(%arg0: i32, %arg1: i32, %arg2: i32) -> (i32, i32) {
    %c0_i32 = arith.constant 0 : i32
    %c0_i32_0 = arith.constant 0 : i32
    return %c0_i32, %arg1 : i32, i32
  }
  func.func @transform_3(%arg0: i32, %arg1: i32, %arg2: i32) -> (i32, i32) {
    %c0_i32 = arith.constant 0 : i32
    return %arg0, %arg1 : i32, i32
  }
}

</mosaic_0001>

<bundles_post_ra>
// kernel: tpu_custom_call.1
= control target key start
LH: loop header
LB: loop body
LE: loop exit
PB: predicated region body
PF: predicated region fallthrough
CT: control target
= control target key end

     0   :  { %s1646_s0 = inlined_call_operand.hbm [shape: f32[16,128], index: 0, kind: input, shape index: {}]   ;;  %s1647_s1 = inlined_call_operand.hbm [shape: bf16[128,3072], index: 1, kind: input, shape index: {}]   ;;  %s1648_s2 = inlined_call_operand.hbm [shape: f32[1,3072], index: 2, kind: input, shape index: {}]   ;;  %s1649_s3 = inlined_call_operand.hbm [shape: bf16[16,3072], index: 3, kind: output, shape index: {}]  }
   0x1   :  { %1659 = sst [smem:[#allocation23_spill]] %s1646_s0 }
   0x2   :  { %1660 = sst [smem:[#allocation24_spill]] %s1647_s1 }
   0x3   :  { %1661 = sst [smem:[#allocation25_spill]] %s1649_s3 }
   0x4   :  { %8 = vsyncpa [#allocation4], 0 }
   0x5   :  { %10 = vsyncpa [#allocation4 + $0x1], 0 }
   0x6   :  { %11 = vsyncpa [#allocation7], 0 }
   0x7   :  { %13 = vsyncpa [#allocation7 + $0x1], 0 }
   0x8   :  { %14 = vsyncpa [#allocation5], 0 }
   0x9   :  { %16 = vsyncpa [#allocation5 + $0x1], 0  ;;  %s1304_s12 = smov 0   ;;  %s1306_s13 = smov 0  }
   0xa   :  { %s1308_s14 = smov 0   ;;  %s1310_s15 = smov 0  }
   0xb   :  { %s1312_s16 = smov 0   ;;  %s1314_s17 = smov 0  }
   0xc   :  { %s1316_s18 = smov 0   ;;  %s1318_s19 = smov 0  }
   0xd   :  { %s1320_s20 = smov 0   ;;  %s1322_s21 = smov 0  }
   0xe   :  { %s1324_s22 = smov 0   ;;  %s1326_s23 = smov 0  }
   0xf   :  { %s1328_s24 = smov 0   ;;  %s1330_s25 = smov 0  }
  0x10 LB: > { %1662 = sst [smem:[#allocation13_spill]] %s1222_s12  ;;  %p58_p0 = scmp.eq.s32.totalorder %s1274_s25, 0  ;;  %s1274_s25 = sphi %s1330_s25, %s22_s25   ;;  %s1270_s24 = sphi %s1328_s24, %s1710_s24   ;;  %s1266_s23 = sphi %s1326_s23, %s1709_s23   ;;  %s1262_s22 = sphi %s1324_s22, %s1696_s22   ;;  %s1258_s21 = sphi %s1322_s21, %s1708_s21   ;;  %s1254_s20 = sphi %s1320_s20, %s1707_s20   ;;  %s1250_s19 = sphi %s1318_s19, %s1706_s19   ;;  %s1246_s18 = sphi %s1316_s18, %s1705_s18   ;;  %s1242_s17 = sphi %s1314_s17, %s1704_s17   ;;  %s1238_s16 = sphi %s1312_s16, %s1703_s16   ;;  %s1234_s15 = sphi %s1310_s15, %s1702_s15   ;;  %s1230_s14 = sphi %s1308_s14, %s1693_s14   ;;  %s1226_s13 = sphi %s1306_s13, %s1701_s13   ;;  %s1222_s12 = sphi %s1304_s12, %s1700_s12  }
  0x11   : > { %1663 = sst [smem:[#allocation14_spill]] %s1230_s14  ;;  %p85_p1 = scmp.ne.s32.totalorder %s1242_s17, %s1238_s16 }
  0x12   : > { %1664 = sst [smem:[#allocation15_spill]] %s1258_s21  ;;  %p1654_p2 = scmp.lt.s32.totalorder %s1274_s25, 12 }
  0x13   : > { %1665 = sst [smem:[#allocation16_spill]] %s1262_s22  ;;  %p87_p3 = por %p85_p1, %p58_p0 }
  0x14   : > { %1666 = sst [smem:[#allocation17_spill]] %s1270_s24  ;;  %s188_s26 = sand.u32 1, %s1274_s25  }
  0x15   : > { %s1650_s27 = sand.u32 1, %s1242_s17   ;;  %s849_s29 = sshll.u32 %s1266_s23, 8 }
  0x16   : > { %s799_s28 = sshll.u32 %s1650_s27, 8  ;;  %s1667_s1 = sld [smem:[#allocation24_spill]] }
  0x17   : > { %s192_s6 = scalar_lea.vmem [#allocation6], %s799_s28  ;;  %p1390_p4 = pnand %p1654_p2, %p87_p3 }
  0x18   : > { %s202_s7 = sshll.u32 %s192_s6, 4  ;;  %p805_p5 = scmp.ge.s32.totalorder %s1274_s25, 1  ;;  %s203_s7 = int_to_ptr.vmem [resolvable:$true] %s202_s7 }
  0x19   : > { %s1395_s9 = scalar_lea.sflag [#allocation7], %s188_s26  ;;  %p1653_p6 = pneg %p1390_p4 }
  0x1a   : > { %s1055_s10 = scalar_lea.vmem %s203_s7, 4096  ;;  %s1276_s11 = smov [#allocation6]  }
  0x1b   : > { %p1056_p7 = scmp.ne.s32.totalorder %s203_s7, %s1055_s10  ;;  %s1060_s28 = sshll.u32 %s1276_s11, 4  ;;  %s1061_s28 = int_to_ptr.vmem [resolvable:$false] %s1060_s28 }
  0x1c   : > { %s201_s5 = scalar_lea.hbm %s1667_s1, %s849_s29  ;;  %s1062_s29 = scalar_lea.vmem %s1061_s28, 8192 }
  0x1d   : > { %p1058_p8 = pnand %p1056_p7, %p1653_p6  ;;  %p1063_p10 = scmp.lt.s32.totalorder %s203_s7, %s1061_s28 }
  0x1e   : > { %p1064_p11 = scmp.lt.s32.totalorder %s1062_s29, %s1055_s10 }
  0x1f   : > { %p1059_p9 = pneg %p1058_p8 }
  0x20   : > { %p1065_p12 = por %p1064_p11, %p1063_p10 }
  0x22   : > { %p1066_p13 = pnand %p1065_p12, %p1059_p9 }
  0x24   : > { %1069 = shalt.err (!%p1066_p13)
}
  0x25   : > { %s1277_s30 = smov 1536   ;;  %s1278_s26 = smov 256  }
  0x26   : > { %s1279_s4 = smov 16   ;;  %p229_p1 = scmp.lt.s32.totalorder %s1274_s25, 13 }
  0x27   : > { %868 = dma.hbm_to_vmem [thread:$0]  (!%p1390_p4), %s201_s5, 4096, %s203_s7, %s1395_s9, %s1277_s30, %s1278_s26, %s1279_s4  }
  0x28   : > { %p1408_p3 = pnand %p805_p5, %p229_p1  ;;  %s1413_s10 = sadd.s32 4294967295, %s1274_s25  }
  0x29   : > { %s37_s28 = sadd.s32 1, %s1266_s23  ;;  %s41_s29 = sadd.s32 1, %s1270_s24 }
  0x2a   : > { %p39_p7 = scmp.ge.s32.totalorder %s37_s28, 6  ;;  %s50_s5 = sadd.s32 1, %s1254_s20 }
  0x2b   : > { %p57_p8 = scmp.ne.s32.totalorder %s1254_s20, %s1250_s19  ;;  %p63_p9 = scmp.ne.s32.totalorder %s1250_s19, %s1246_s18 }
  0x2c   : > { %s1712_s28 = smov (%p39_p7, %s37_s28), 0  ;;  %s1714_s29 = smov (!%p39_p7, %s41_s29), %s1270_s24 }
  0x2d   : > { %1670 = sst [smem:[#allocation18_spill]] %s1712_s28  ;;  %p1428_p5 = por %p58_p0, %p57_p8 }
  0x2e   : > { %p64_p10 = scmp.eq.s32.totalorder %s1413_s10, 0  ;;  %p43_p11 = scmp.ge.s32.totalorder %s1714_s29, 2 }
  0x2f   : > { %s74_s30 = ssub.s32 %s1266_s23, %s1712_s28  ;;  %s78_s26 = sadd.s32 1, %s1242_s17 }
  0x30   : > { %p1435_p12 = por %p64_p10, %p63_p9  ;;  %p76_p13 = scmp.eq.s32.totalorder %s74_s30, 0 }
  0x31   : > { %s1716_s29 = smov (%p43_p11, %s1714_s29), 0  ;;  %p91_p0 = scmp.ne.s32.totalorder %s1238_s16, %s1234_s15 }
  0x32   : > { %1673 = sst [smem:[#allocation19_spill]] %s1716_s29  ;;  %s45_s4 = ssub.s32 %s1270_s24, %s1716_s29 }
  0x33   : > { %s132_s27 = sadd.s32 1, %s1230_s14  ;;  %p48_p1 = scmp.eq.s32.totalorder %s45_s4, 0 }
  0x34   : > { %p1447_p7 = por %p91_p0, %p64_p10  ;;  %s129_s3 = sor.u32 %s74_s30, %s45_s4 }
  0x35   : > { %s1452_s1 = scalar_select %p76_p13, %s1242_s17, %s78_s26  }
  0x36   : > { %s1455_s28 = scalar_select %p48_p1, %s1254_s20, %s50_s5  }
  0x37   : > { %1675 = sst [smem:[#allocation20_spill]] %s1452_s1  ;;  %p142_p8 = scmp.ne.s32.totalorder %s1230_s14, %s1226_s13 }
  0x38   : > { %1676 = sst [smem:[#allocation21_spill]] %s1455_s28  ;;  %p130_p9 = scmp.eq.s32.totalorder %s129_s3, 0 }
  0x39   : > { %p143_p11 = scmp.eq.s32.totalorder %s1413_s10, 11  ;;  %p148_p6 = scmp.ne.s32.totalorder %s1226_s13, %s1222_s12 }
  0x3a   : > { %s1677_s15 = sadd.s32 4294967294, %s1274_s25   ;;  %s169_s5 = sand.u32 1, %s1254_s20  }
  0x3b   : > { %p149_p2 = scmp.eq.s32.totalorder %s1677_s15, 11  ;;  %p1467_p10 = por %p143_p11, %p142_p8 }
  0x3c   : > { %s1465_s29 = scalar_select %p130_p9, %s1230_s14, %s132_s27  }
  0x3d   : > { %p1471_p13 = por %p149_p2, %p148_p6  ;;  %s798_s28 = sshll.u32 %s1270_s24, 7 }
  0x3e   : > { %1678 = sst [smem:[#allocation22_spill]] %s1465_s29  ;;  %s797_s30 = sshll.u32 %s169_s5, 3 }
  0x3f   : > { %s1680_s26 = scalar_select %p1471_p13, 1, 0 }
  0x40   : > { %s1681_s0 = sld [smem:[#allocation23_spill]]  ;;  %s173_s12 = scalar_lea.vmem [#allocation3], %s797_s30 }
  0x41   : > { %s181_s22 = sshll.u32 %s173_s12, 4  ;;  %p1682_p0 = scmp.lt.s32.totalorder %s1274_s25, 12  ;;  %s182_s22 = int_to_ptr.vmem [resolvable:$true] %s181_s22 }
  0x42   : > { %s1684_s15 = sand.u32 1, %s1242_s17   ;;  %s170_s14 = scalar_lea.sflag [#allocation4], %s169_s5 }
  0x43   : > { %p1484_p1 = pnand %p1682_p0, %p1428_p5  ;;  %s802_s29 = sshll.u32 %s1684_s15, 2 }
  0x44   : > { %s1083_s24 = scalar_lea.vmem %s182_s22, 128  ;;  %s1280_s1 = smov [#allocation3]  }
  0x45   : > { %p1072_p2 = pneg %p1484_p1  ;;  %p1084_p6 = scmp.ne.s32.totalorder %s182_s22, %s1083_s24 }
  0x46   : > { %s179_s3 = scalar_lea.hbm %s1681_s0, %s798_s28  ;;  %s1088_s28 = sshll.u32 %s1280_s1, 4  ;;  %s1089_s28 = int_to_ptr.vmem [resolvable:$false] %s1088_s28 }
  0x47   : > { %p1086_p8 = pnand %p1084_p6, %p1072_p2  ;;  %s1090_s12 = scalar_lea.vmem %s1089_s28, 256 }
  0x48   : > { %p1091_p11 = scmp.lt.s32.totalorder %s182_s22, %s1089_s28  ;;  %p1092_p5 = scmp.lt.s32.totalorder %s1090_s12, %s1083_s24 }
  0x49   : > { %p1087_p9 = pneg %p1086_p8 }
  0x4a   : > { %p1093_p0 = por %p1092_p5, %p1091_p11 }
  0x4c   : > { %p1094_p13 = pnand %p1093_p0, %p1087_p9 }
  0x4e   : > { %1097 = shalt.err (!%p1094_p13)
}
  0x4f   : > { %865 = dma.hbm_to_vmem [thread:$0]  (!%p1484_p1), %s179_s3, 128, %s182_s22, %s170_s14  }
  0x50   : > { %s850_s7 = sshll.u32 %s1266_s23, 6  ;;  %s216_s5 = scalar_lea.vmem [#allocation8], %s802_s29 }
  0x51   : > { %s224_s30 = sshll.u32 %s216_s5, 4  ;;  %s222_s0 = scalar_lea.hbm %s1648_s2, %s850_s7  ;;  %s225_s30 = int_to_ptr.vmem [resolvable:$true] %s224_s30 }
  0x52   : > { %s1111_s1 = scalar_lea.vmem %s225_s30, 64  ;;  %p1685_p6 = pneg %p1390_p4 }
  0x53   : > { %p1112_p2 = scmp.ne.s32.totalorder %s225_s30, %s1111_s1  ;;  %s1281_s24 = smov [#allocation8]  }
  0x54   : > { %s1116_s28 = sshll.u32 %s1281_s24, 4  ;;  %s1117_s28 = int_to_ptr.vmem [resolvable:$false] %s1116_s28 }
  0x55   : > { %p1114_p8 = pnand %p1112_p2, %p1685_p6  ;;  %s1118_s27 = scalar_lea.vmem %s1117_s28, 128 }
  0x56   : > { %p1119_p13 = scmp.lt.s32.totalorder %s225_s30, %s1117_s28  ;;  %p1120_p1 = scmp.lt.s32.totalorder %s1118_s27, %s1111_s1 }
  0x57   : > { %p1115_p9 = pneg %p1114_p8 }
  0x58   : > { %p1121_p11 = por %p1120_p1, %p1119_p13 }
  0x5a   : > { %p1122_p5 = pnand %p1121_p11, %p1115_p9 }
  0x5c   : > { %1125 = shalt.err (!%p1122_p5)
}
  0x5d   : > { %871 = dma.hbm_to_vmem [thread:$0]  (!%p1390_p4), %s222_s0, 64, %s225_s30, %s1395_s9  }
  0x5e   : > { %233 = sbr.rel (%p1408_p3) target bundleno = 350 (0x15e), region = 32  ;;  %s235_s14 = sand.u32 (!%p1408_p3), 1, %s1250_s19  }
  0x5f   : > { %s1507_s22 = sshll.u32 (!%p1408_p3), %s235_s14, 3  ;;  %s236_s29 = scalar_lea.sflag (!%p1408_p3), [#allocation4], %s235_s14 }
  0x60   : > { %s239_s3 = scalar_lea.vmem (!%p1408_p3), [#allocation3], %s1507_s22 }
  0x63   : > { %1209 = dma.done.wait (%p1435_p12), %s236_s29, 128  }
  0x64   : > { %1211 = vsyncadd (%p1435_p12), %s236_s29, 4294967168  ;;  %s244_s0 = sand.u32 1, %s1413_s10   ;;  %s246_s8 = sand.u32 1, %s1238_s16  }
  0x65   : > { %s807_s9 = sshll.u32 %s246_s8, 8  ;;  %s245_s6 = scalar_lea.sflag [#allocation7], %s244_s0 }
  0x66   : > { %s1518_s12 = scalar_lea.vmem [#allocation6], %s807_s9 }
  0x67   : > { %1213 = dma.done.wait (%p1447_p7), %s245_s6, 4160  }
  0x68   : > { %1215 = vsyncadd (%p1447_p7), %s245_s6, 4294963136  ;;  %v1282_v0 = vmov 0   ;;  %v994_v1 = vld [vmem:[%s1518_s12 + $0xe4] ss:$16 sps:$4 sm:$0xff]   ;;  %v996_v2 = vld [vmem:[%s1518_s12 + $0xec] ss:$16 sps:$4 sm:$0xff]   ;;  %v600_v35 = vlaneseq }
  0x69   : > { %533 = vmatprep.mubr.bf16.mxu0 %v1282_v0  ;;  %574 = vmatprep.mubr.bf16.mxu1 %v1282_v0  ;;  %v998_v3 = vld [vmem:[%s1518_s12 + $0xe0] ss:$16 sps:$4 sm:$0xff]   ;;  %v999_v4 = vld [vmem:[%s1518_s12 + $0xe8] ss:$16 sps:$4 sm:$0xff]   ;;  %v1000_v5 = vld [vmem:[%s1518_s12 + $0xc4] ss:$16 sps:$4 sm:$0xff]  }
  0x6a   : > { %501 = vmatprep.subr.bf16.mxu0 %v994_v1  ;;  %542 = vmatprep.subr.bf16.mxu1 %v996_v2  ;;  %v1002_v6 = vld [vmem:[%s1518_s12 + $0xcc] ss:$16 sps:$4 sm:$0xff]   ;;  %v1004_v7 = vld [vmem:[%s1518_s12 + $0xc0] ss:$16 sps:$4 sm:$0xff]   ;;  %v1005_v8 = vld [vmem:[%s1518_s12 + $0xc8] ss:$16 sps:$4 sm:$0xff]  }
  0x6b   : > { %502 = vmatpush1.bf16.msra.mxu0 %v998_v3  ;;  %543 = vmatpush1.bf16.msra.mxu1 %v999_v4  ;;  %v1006_v9 = vld [vmem:[%s1518_s12 + $0xa4] ss:$16 sps:$4 sm:$0xff]   ;;  %v1008_v10 = vld [vmem:[%s1518_s12 + $0xac] ss:$16 sps:$4 sm:$0xff]   ;;  %v1010_v11 = vld [vmem:[%s1518_s12 + $0xa0] ss:$16 sps:$4 sm:$0xff]  }
  0x6c   : > { %503 = vmatprep.subr.bf16.mxu0 %v1000_v5  ;;  %544 = vmatprep.subr.bf16.mxu1 %v1002_v6  ;;  %v1011_v12 = vld [vmem:[%s1518_s12 + $0xa8] ss:$16 sps:$4 sm:$0xff]   ;;  %v1012_v13 = vld [vmem:[%s1518_s12 + $0x84] ss:$16 sps:$4 sm:$0xff]   ;;  %v1014_v14 = vld [vmem:[%s1518_s12 + $0x8c] ss:$16 sps:$4 sm:$0xff]  }
  0x6d   : > { %v1016_v15 = vld [vmem:[%s1518_s12 + $0x80] ss:$16 sps:$4 sm:$0xff]   ;;  %v1017_v16 = vld [vmem:[%s1518_s12 + $0x88] ss:$16 sps:$4 sm:$0xff]   ;;  %v1018_v17 = vld [vmem:[%s1518_s12 + $0x64] ss:$16 sps:$4 sm:$0xff]  }
  0x6e   : > { %v1020_v18 = vld [vmem:[%s1518_s12 + $0x6c] ss:$16 sps:$4 sm:$0xff]   ;;  %v1022_v19 = vld [vmem:[%s1518_s12 + $0x60] ss:$16 sps:$4 sm:$0xff]   ;;  %v1023_v20 = vld [vmem:[%s1518_s12 + $0x68] ss:$16 sps:$4 sm:$0xff]  }
  0x6f   : > { %504 = vmatpush1.bf16.msra.mxu0 %v1004_v7  ;;  %545 = vmatpush1.bf16.msra.mxu1 %v1005_v8  ;;  %v1024_v21 = vld [vmem:[%s1518_s12 + $0x44] ss:$16 sps:$4 sm:$0xff]   ;;  %v1026_v22 = vld [vmem:[%s1518_s12 + $0x4c] ss:$16 sps:$4 sm:$0xff]   ;;  %v1028_v23 = vld [vmem:[%s1518_s12 + $0x40] ss:$16 sps:$4 sm:$0xff]  }
  0x70   : > { %505 = vmatprep.subr.bf16.mxu0 %v1006_v9  ;;  %546 = vmatprep.subr.bf16.mxu1 %v1008_v10  ;;  %v1029_v24 = vld [vmem:[%s1518_s12 + $0x48] ss:$16 sps:$4 sm:$0xff]   ;;  %v1030_v25 = vld [vmem:[%s1518_s12 + $0x24] ss:$16 sps:$4 sm:$0xff]   ;;  %v1032_v26 = vld [vmem:[%s1518_s12 + $0x2c] ss:$16 sps:$4 sm:$0xff]  }
  0x71   : > { %v1034_v27 = vld [vmem:[%s1518_s12 + $0x20] ss:$16 sps:$4 sm:$0xff]   ;;  %v1035_v28 = vld [vmem:[%s1518_s12 + $0x28] ss:$16 sps:$4 sm:$0xff]   ;;  %v1036_v29 = vld [vmem:[%s1518_s12 + $0x4] ss:$16 sps:$4 sm:$0xff]  }
  0x72   : > { %v1038_v30 = vld [vmem:[%s1518_s12 + $0xc] ss:$16 sps:$4 sm:$0xff]   ;;  %v1040_v31 = vld [vmem:[%s1518_s12] ss:$16 sps:$4 sm:$0xff]   ;;  %v1041_v32 = vld [vmem:[%s1518_s12 + $0x8] ss:$16 sps:$4 sm:$0xff]  }
  0x73   : > { %506 = vmatpush1.bf16.msra.mxu0 %v1010_v11  ;;  %547 = vmatpush1.bf16.msra.mxu1 %v1011_v12  ;;  %v307_v33 = vld [vmem:[%s239_s3] sm:$0xff]  ;;  %s1686_s10 = sld [smem:[#allocation16_spill]]  ;;  %s808_s18 = sshll.u32 %s246_s8, 2  ;;  %v601_v36 = vshrl.u32 %v600_v35, 7 }
  0x74   : > { %507 = vmatprep.subr.bf16.mxu0 %v1012_v13  ;;  %548 = vmatprep.subr.bf16.mxu1 %v1014_v14  ;;  %v308_v34 = vpack.c.bf16 %v307_v33, %v307_v33  ;;  %s1687_s11 = sld [smem:[#allocation15_spill]]  ;;  %s287_s7 = sand.u32 1, %s1226_s13  }
  0x75   : > { %v602_v37 = vsub.s32 0, %v601_v36  ;;  %v610_v38 = vsub.s32 2, %v601_v36  ;;  %v606_v39 = vsub.s32 1, %v601_v36  ;;  %v614_v40 = vsub.s32 3, %v601_v36  ;;  %s257_s30 = scalar_lea.vmem [#allocation8], %s808_s18  ;;  %s809_s4 = sshll.u32 %s287_s7, 4 }
  0x76   : > { %v598_v41 = vld [vmem:[%s257_s30] sm:$0xf]  ;;  %s289_s28 = scalar_lea.vmem [#allocation9], %s809_s4  ;;  %s1688_s29 = sld [smem:[#allocation25_spill]] }
  0x77   : > { %508 = vmatpush1.bf16.msra.mxu0 %v1016_v15  ;;  %549 = vmatpush1.bf16.msra.mxu1 %v1017_v16  ;;  %v603_v42 = vrot.slane %v598_v41, %v602_v37  ;;  %v611_v43 = vrot.slane %v598_v41, %v610_v38  ;;  %v607_v44 = vrot.slane %v598_v41, %v606_v39  ;;  %s659_s27 = sshll.u32 %s289_s28, 4  ;;  %s643_s0 = scalar_lea.sflag [#allocation5], %s287_s7  ;;  %s1570_s27 = int_to_ptr.vmem [resolvable:$true] %s659_s27 }
  0x78   : > { %509 = vmatprep.subr.bf16.mxu0 %v1018_v17  ;;  %550 = vmatprep.subr.bf16.mxu1 %v1020_v18  ;;  %v615_v45 = vrot.slane %v598_v41, %v614_v40  ;;  %s1126_s8 = scalar_lea.vmem %s1570_s27, 256  ;;  %s1283_s9 = smov [#allocation9]  }
  0x79   : > { %s853_s5 = smul.u32 24, %s1686_s10  ;;  %p1127_p4 = scmp.ne.s32.totalorder %s1570_s27, %s1126_s8 }
  0x7a   : > { %s845_s15 = sshll.u32 %s1687_s11, 2  ;;  %s1130_s6 = sshll.u32 %s1283_s9, 4  ;;  %s1131_s6 = int_to_ptr.vmem [resolvable:$false] %s1130_s6 }
  0x7b   : > { %510 = vmatpush1.bf16.msra.mxu0 %v1022_v19  ;;  %551 = vmatpush1.bf16.msra.mxu1 %v1023_v20  ;;  %s655_s1 = sadd.s32 %s853_s5, %s845_s15  ;;  %p1128_p3 = pnand %p1127_p4, %p1467_p10 }
  0x7c   : > { %511 = vmatprep.subr.bf16.mxu0 %v1024_v21  ;;  %552 = vmatprep.subr.bf16.mxu1 %v1026_v22  ;;  %s846_s24 = sshll.u32 %s655_s1, 6  ;;  %s1132_s12 = scalar_lea.vmem %s1131_s6, 512 }
  0x7d   : > { %s1568_s3 = scalar_lea.hbm %s1688_s29, %s846_s24  ;;  %p1129_p12 = pneg %p1128_p3 }
  0x7e   : > { %p1133_p7 = scmp.lt.s32.totalorder %s1570_s27, %s1131_s6  ;;  %p1134_p0 = scmp.lt.s32.totalorder %s1132_s12, %s1126_s8 }
  0x7f   : > { %512 = vmatpush1.bf16.msra.mxu0 %v1028_v23  ;;  %553 = vmatpush1.bf16.msra.mxu1 %v1029_v24 }
  0x80   : > { %513 = vmatprep.subr.bf16.mxu0 %v1030_v25  ;;  %554 = vmatprep.subr.bf16.mxu1 %v1032_v26  ;;  %p1135_p2 = por %p1134_p0, %p1133_p7 }
  0x82   : > { %p1136_p6 = pnand %p1135_p2, %p1129_p12 }
  0x83   : > { %514 = vmatpush1.bf16.msra.mxu0 %v1034_v27  ;;  %555 = vmatpush1.bf16.msra.mxu1 %v1035_v28 }
  0x84   : > { %515 = vmatprep.subr.bf16.mxu0 %v1036_v29  ;;  %556 = vmatprep.subr.bf16.mxu1 %v1038_v30 }
  0x87   : > { %516 = vmatpush1.bf16.msra.mxu0 %v1040_v31  ;;  %557 = vmatpush1.bf16.msra.mxu1 %v1041_v32 }
  0x8a   : > { %534 = vmatmul.mubr.bf16.vlgmr.msra.gmra.mxu0 %v308_v34  ;;  %575 = vmatmul.mubr.bf16.vlgmr.msra.gmra.mxu1 %v308_v34 }
 0x14a   : > { %v535_v46 = vpop.f32.mrf.mxu0  ;;  %v576_v47 = vpop.f32.mrf.mxu1 }
 0x14b   : > { %v620_v50 = vadd.f32 %v603_v42, %v535_v46  ;;  %v622_v51 = vadd.f32 %v611_v43, %v576_v47 }
 0x14c   : > { %v537_v48 = vpop.f32.mrf.mxu0  ;;  %v578_v49 = vpop.f32.mrf.mxu1 }
 0x14d   : > { %v621_v52 = vadd.f32 %v607_v44, %v537_v48  ;;  %v623_v53 = vadd.f32 %v615_v45, %v578_v49 }
 0x14e   : > { %v539_v54 = vpop.f32.mrf.mxu0  ;;  %v580_v55 = vpop.f32.mrf.mxu1 }
 0x14f   : > { %v851_v56 = vpack.c.bf16 %v621_v52, %v620_v50  ;;  %v852_v57 = vpack.c.bf16 %v623_v53, %v622_v51 }
 0x150   : > { %v540_v58 = vpop.f32.mrf.mxu0  ;;  %v581_v59 = vpop.f32.mrf.mxu1 }
 0x151   : > { %640 = vst [vmem:[%s289_s28] sm:$0xff] %v851_v56  ;;  %641 = vst [vmem:[%s289_s28 + $0x8] sm:$0xff] %v852_v57 }
 0x152   : > { %1139 = shalt.err (!%p1136_p6)
}
 0x153   : > { %s1140_s10 = scalar_lea.hbm %s1568_s3, 256  ;;  %s1144_s7 = scalar_lea.hbm %s1688_s29, 3072 }
 0x154   : > { %p1141_p8 = scmp.ne.s32.totalorder %s1568_s3, %s1140_s10  ;;  %p1145_p1 = scmp.lt.s32.totalorder %s1568_s3, %s1688_s29 }
 0x155   : > { %p1146_p11 = scmp.lt.s32.totalorder %s1144_s7, %s1140_s10 }
 0x156   : > { %p1142_p9 = pnand %p1141_p8, %p1467_p10 }
 0x157   : > { %p1147_p5 = por %p1146_p11, %p1145_p1 }
 0x158   : > { %p1143_p13 = pneg %p1142_p9 }
 0x15a   : > { %p1148_p4 = pnand %p1147_p5, %p1143_p13 }
 0x15c   : > { %1151 = shalt.err (!%p1148_p4)
}
 0x15d   : > { %860 = dma.vmem_to_hbm [thread:$0]  (%p1467_p10), %s1570_s27, 256, %s1568_s3, %s643_s0  }
 0x15e PF: > { %s1689_s4 = sld [smem:[#allocation13_spill]]  ;;  %p877_p3 = scmp.ge.s32.totalorder %s1274_s25, 2 }
 0x15f   : > { %p1690_p12 = scmp.ne.s32.totalorder %s1680_s26, 0 }
 0x161   : > { %p873_p7 = pnand %p877_p3, %p1690_p12 }
 0x163   : > { %p874_p0 = pneg %p873_p7 }
 0x164   : > { %s671_s15 = sand.u32 1, %s1689_s4  }
 0x165   : > { %s672_s1 = scalar_lea.sflag [#allocation5], %s671_s15 }
 0x166   : > { %1217 = dma.done.wait (%p874_p0), %s672_s1, 256  }
 0x167   : > { %1219 = vsyncadd (%p874_p0), %s672_s1, 4294967040  ;;  %s22_s25 = sadd.s32 1, %s1274_s25   ;;  %s1692_s21 = sld [smem:[#allocation14_spill]] }
 0x168   : > { %p1599_p2 = scmp.ge.s32.totalorder %s22_s25, 14   ;;  %s1693_s14 = sld [smem:[#allocation22_spill]] }
 0x169   : > { %s1694_s28 = sld [smem:[#allocation20_spill]]  ;;  %s1700_s12 = smov %s1226_s13 }
 0x16a   : > { %s1695_s26 = sld [smem:[#allocation21_spill]]  ;;  %s1702_s15 = smov %s1238_s16 }
 0x16b   : > { %s1696_s22 = sld [smem:[#allocation17_spill]]  ;;  %s1703_s16 = smov %s1242_s17 }
 0x16c   : > { %s1697_s27 = sld [smem:[#allocation18_spill]]  ;;  %s1705_s18 = smov %s1250_s19 }
 0x16d   : > { %s1698_s3 = sld [smem:[#allocation19_spill]]  ;;  %s1701_s13 = smov %s1692_s21 }
 0x16e   : > { %s1706_s19 = smov %s1254_s20  ;;  %s1708_s21 = smov %s1266_s23 }
 0x16f   : > { %s1704_s17 = smov %s1694_s28  ;;  %21 = sbr.rel (!%p1599_p2) target bundleno = 16 (0x10), region = 109 }
 0x170   : > { %s1707_s20 = smov %s1695_s26 }
 0x172   : > { %s1709_s23 = smov %s1697_s27 }
 0x173   : > { %s1710_s24 = smov %s1698_s3 }
 0x174   :  { %677 = vsyncpa [#allocation4], 1 }
 0x175   :  { %679 = vsyncpa [#allocation4 + $0x1], 1 }
 0x176   :  { %680 = vsyncpa [#allocation7], 1 }
 0x177   :  { %682 = vsyncpa [#allocation7 + $0x1], 1 }
 0x178   :  { %683 = vsyncpa [#allocation5], 1 }
 0x179   :  { %685 = vsyncpa [#allocation5 + $0x1], 1 }

</bundles_post_ra>
